<compile_context>
chip_gen: v6e
topology: v6e:2x2x1
jax: 0.10.0
libtpu: 0.0.40
codegen_flags: <defaults>
</compile_context>

<pallas_src>
import functools

import jax
import jax.numpy as jnp
from jax.experimental import pallas as pl
from jax.experimental.pallas import tpu as pltpu

_LANES = 128
_TARGET_BLOCK_BYTES = 2 * 1024 * 1024      # ~2 MiB per input block (mem-bound sweet spot)
_VMEM_LIMIT = 48 * 1024 * 1024             # explicit; fits v7x (64 MiB) with headroom


# ---------------------------------------------------------------------------
# tiling / layout helpers
# ---------------------------------------------------------------------------
def _tiling(total_elems, itemsize):
    """Choose (tile_rows, padded_rows, grid) for a flat lane-dense (rows, 128) layout."""
    rows = -(-total_elems // _LANES)
    rows = -(-rows // 16) * 16                               # sublane-tile aligned (covers bf16)
    tile_rows = max(16, _TARGET_BLOCK_BYTES // (_LANES * itemsize))
    tile_rows = min(tile_rows, rows)
    tile_rows = max(16, (tile_rows // 16) * 16)
    padded_rows = -(-rows // tile_rows) * tile_rows
    return tile_rows, padded_rows, padded_rows // tile_rows


def _lane_dense(x, padded_rows, fill=0):
    """Flatten, zero-pad to padded_rows*128 and reshape to (padded_rows, 128)."""
    flat = x.reshape(-1)
    pad = padded_rows * _LANES - flat.shape[0]
    if pad:
        flat = jnp.pad(flat, (0, pad), constant_values=fill)
    return flat.reshape(padded_rows, _LANES)


# ---------------------------------------------------------------------------
# shared in-kernel math (margins are static Python floats -> branches fold away)
# ---------------------------------------------------------------------------
def _elementwise_loss(p, t, w, pos_margin, neg_margin):
    p = p.astype(jnp.float32)
    t = t.astype(jnp.float32)
    if w is not None:
        w = w.astype(jnp.float32)
        t = jnp.where(w <= 0.0, jnp.float32(-1.0), t)        # target[weight <= 0] = -1
    if pos_margin > 0:
        p = jnp.where(t == 1.0, p - jnp.float32(pos_margin), p)
    if neg_margin > 0:
        p = jnp.where(t == 0.0, p - jnp.float32(neg_margin), p)
    p = jnp.clip(p, 0.0, 1.0)                                 # pred = clamp(pred, 0, 1)
    d = p - t
    l = d * d                                                 # |.|**2 without jnp.abs
    if w is not None:
        l = l * w
    return l, w


# ---------------------------------------------------------------------------
# kernels
# ---------------------------------------------------------------------------
def _make_sum_kernel(pos_margin, neg_margin, has_weight, tile_rows):
    """Sum-only kernel: per-program (8,128) partials, no elementwise writeback."""
    n_groups = tile_rows // 8

    def _partial(x):
        # (tile_rows, 128) -> (8, 128): layout-preserving reshape + pure vreg adds
        return jnp.sum(x.reshape(n_groups, 8, _LANES), axis=0)

    if has_weight:
        def kernel(p_ref, t_ref, w_ref, sum_ref, cnt_ref):
            l, w = _elementwise_loss(p_ref[...], t_ref[...], w_ref[...],
                                     pos_margin, neg_margin)
            sum_ref[0] = _partial(l)
            cnt_ref[0] = _partial((w > 0.0).astype(jnp.float32))
        return kernel

    def kernel(p_ref, t_ref, sum_ref):
        l, _ = _elementwise_loss(p_ref[...], t_ref[...], None, pos_margin, neg_margin)
        sum_ref[0] = _partial(l)
    return kernel


def _make_elem_kernel(pos_margin, neg_margin, has_weight):
    """Elementwise kernel (only needed for reduction='none')."""
    if has_weight:
        def kernel(p_ref, t_ref, w_ref, loss_ref):
            l, _ = _elementwise_loss(p_ref[...], t_ref[...], w_ref[...],
                                     pos_margin, neg_margin)
            loss_ref[...] = l
        return kernel

    def kernel(p_ref, t_ref, loss_ref):
        l, _ = _elementwise_loss(p_ref[...], t_ref[...], None, pos_margin, neg_margin)
        loss_ref[...] = l
    return kernel


# ---------------------------------------------------------------------------
# pallas_call wrappers
# ---------------------------------------------------------------------------
@functools.partial(jax.jit, static_argnames=("pos_margin", "neg_margin"))
def _l2_sum_pallas(pred, target, weight, *, pos_margin, neg_margin):
    """Returns (loss_sum, avg_factor) without materializing the elementwise loss."""
    total = pred.size
    itemsize = max(jnp.dtype(pred.dtype).itemsize, jnp.dtype(target.dtype).itemsize)
    tile_rows, padded_rows, grid = _tiling(total, itemsize)

    has_weight = weight is not None
    kernel = _make_sum_kernel(pos_margin, neg_margin, has_weight, tile_rows)

    in_arrays = [_lane_dense(pred, padded_rows), _lane_dense(target, padded_rows)]
    in_block = pl.BlockSpec((tile_rows, _LANES), lambda i: (i, 0))
    in_specs = [in_block, in_block]
    part_shape = jax.ShapeDtypeStruct((grid, 8, _LANES), jnp.float32)
    part_spec = pl.BlockSpec((1, 8, _LANES), lambda i: (i, 0, 0))

    if has_weight:
        # padded weight = 0 -> padded elements contribute nothing to sum or count
        in_arrays.append(_lane_dense(weight, padded_rows))
        in_specs.append(in_block)
        out_shape = (part_shape, part_shape)
        out_specs = (part_spec, part_spec)
    else:
        out_shape = part_shape
        out_specs = part_spec

    outs = pl.pallas_call(
        kernel,
        out_shape=out_shape,
        grid_spec=pltpu.PrefetchScalarGridSpec(
            num_scalar_prefetch=0,
            grid=(grid,),
            in_specs=in_specs,
            out_specs=out_specs,
        ),
        compiler_params=pltpu.CompilerParams(
            dimension_semantics=("parallel",),      # per-program partials -> both TCs on v7x
            vmem_limit_bytes=_VMEM_LIMIT),
    )(*in_arrays)

    if has_weight:
        sum_partials, cnt_partials = outs
        return jnp.sum(sum_partials), jnp.sum(cnt_partials)
    # weight=None: avg_factor = numel, computed on host (no ones() stream DMA'd)
    return jnp.sum(outs), jnp.float32(total)


@functools.partial(jax.jit, static_argnames=("pos_margin", "neg_margin"))
def _l2_elem_pallas(pred, target, weight, *, pos_margin, neg_margin):
    """Elementwise weighted loss (reduction='none')."""
    total = pred.size
    orig_shape = pred.shape
    tile_rows, padded_rows, grid = _tiling(total, 4)   # f32 output stream dominates

    has_weight = weight is not None
    kernel = _make_elem_kernel(pos_margin, neg_margin, has_weight)

    in_arrays = [_lane_dense(pred, padded_rows), _lane_dense(target, padded_rows)]
    in_block = pl.BlockSpec((tile_rows, _LANES), lambda i: (i, 0))
    in_specs = [in_block, in_block]
    if has_weight:
        in_arrays.append(_lane_dense(weight, padded_rows))
        in_specs.append(in_block)

    loss2 = pl.pallas_call(
        kernel,
        out_shape=jax.ShapeDtypeStruct((padded_rows, _LANES), jnp.float32),
        grid_spec=pltpu.PrefetchScalarGridSpec(
            num_scalar_prefetch=0,
            grid=(grid,),
            in_specs=in_specs,
            out_specs=pl.BlockSpec((tile_rows, _LANES), lambda i: (i, 0)),
        ),
        compiler_params=pltpu.CompilerParams(
            dimension_semantics=("parallel",),
            vmem_limit_bytes=_VMEM_LIMIT),
    )(*in_arrays)

    return loss2.reshape(-1)[:total].reshape(orig_shape)


# ---------------------------------------------------------------------------
# module
# ---------------------------------------------------------------------------
class L2LossPallas:
    """JAX/Pallas equivalent of mmdet3d L2Loss (forward only)."""

    def __init__(self, neg_pos_ub=-1, pos_margin=-1, neg_margin=-1,
                 hard_mining=False, reduction='mean', loss_weight=1.0):
        # TODO(synk): neg_pos_ub > 0 negative subsampling (np.random.shuffle /
        # topk hard mining) is host-side data-dependent logic; not translated.
        self.neg_pos_ub = neg_pos_ub
        self.pos_margin = float(pos_margin)
        self.neg_margin = float(neg_margin)
        self.hard_mining = hard_mining
        self.reduction = reduction
        self.loss_weight = float(loss_weight)

    def __call__(self, pred, target, weight=None, avg_factor=None,
                 reduction_override=None):
        assert reduction_override in (None, 'none', 'mean', 'sum')
        reduction = reduction_override if reduction_override else self.reduction
        assert pred.shape == target.shape

        def _norm(x):
            x = jnp.asarray(x)
            # bf16/f32 stay as-is (upcast happens inside the kernel -> halves input DMA
            # for bf16 callers); anything else goes to f32.
            return x if x.dtype in (jnp.float32, jnp.bfloat16) else x.astype(jnp.float32)

        pred = _norm(pred)
        target = _norm(target)
        if weight is not None:
            weight = _norm(weight)
            assert weight.shape == target.shape

        # update_weight always recomputes avg_factor = (weight > 0).sum(); any
        # caller-provided avg_factor is overwritten (matches the reference module).
        if reduction == 'mean':
            loss_sum, avg = _l2_sum_pallas(
                pred, target, weight,
                pos_margin=self.pos_margin, neg_margin=self.neg_margin)
            return self.loss_weight * loss_sum / avg
        elif reduction == 'none':
            elem = _l2_elem_pallas(
                pred, target, weight,
                pos_margin=self.pos_margin, neg_margin=self.neg_margin)
            return self.loss_weight * elem
        else:
            # In the reference module update_weight always yields a non-None
            # avg_factor, and weight_reduce_loss raises for 'sum' in that case.
            raise ValueError('avg_factor can not be used with reduction="sum"')


# ---------------------------------------------------------------------------
# plain-JAX reference (module semantics) + demo
# ---------------------------------------------------------------------------
def _reference(pred, target, weight, pos_margin, neg_margin, reduction, loss_weight):
    pred = pred.astype(jnp.float32)
    target = target.astype(jnp.float32)
    if weight is None:
        weight = jnp.ones_like(target)
    weight = weight.astype(jnp.float32)
    target = jnp.where(weight <= 0.0, -1.0, target)
    if pos_margin > 0:
        pred = jnp.where(target == 1.0, pred - pos_margin, pred)
    if neg_margin > 0:
        pred = jnp.where(target == 0.0, pred - neg_margin, pred)
    pred = jnp.clip(pred, 0.0, 1.0)
    loss = jnp.abs(pred - target) ** 2 * weight
    if reduction == 'mean':
        return loss_weight * jnp.sum(loss) / jnp.sum((weight > 0).astype(jnp.float32))
    return loss_weight * loss


if __name__ == "__main__":
    key = jax.random.PRNGKey(0)
    k1, k2, k3 = jax.random.split(key, 3)

    # small (num_samples, num_classes)-style shape; deliberately not 128-aligned
    R, C = 96, 80
    pred = jax.random.uniform(k1, (R, C), dtype=jnp.float32, minval=-0.2, maxval=1.2)
    target = jax.random.bernoulli(k2, p=0.1, shape=(R, C)).astype(jnp.float32)
    weight = (jax.random.uniform(k3, (R, C)) > 0.25).astype(jnp.float32)

    # 1) default path: mean reduction, no weight (2 HBM streams, no elementwise writeback)
    loss_mod = L2LossPallas(reduction='mean', loss_weight=1.0)
    out = jax.block_until_ready(loss_mod(pred, target))
    ref = _reference(pred, target, None, -1.0, -1.0, 'mean', 1.0)
    assert jnp.allclose(out, ref, rtol=1e-5, atol=1e-6), (out, ref)

    # 2) mean reduction with explicit 0/1 weight (zeros excluded from avg_factor)
    out = jax.block_until_ready(loss_mod(pred, target, weight))
    ref = _reference(pred, target, weight, -1.0, -1.0, 'mean', 1.0)
    assert jnp.allclose(out, ref, rtol=1e-5, atol=1e-6), (out, ref)

    # 3) 'none' reduction with weight + margins
    loss_mod2 = L2LossPallas(pos_margin=0.1, neg_margin=0.05,
                             reduction='none', loss_weight=2.0)
    out = jax.block_until_ready(loss_mod2(pred, target, weight))
    ref = _reference(pred, target, weight, 0.1, 0.05, 'none', 2.0)
    assert jnp.allclose(out, ref, rtol=1e-5, atol=1e-6), (out, ref)

    # 4) reduction_override: 'none' from a 'mean'-configured module, no weight
    out = jax.block_until_ready(loss_mod(pred, target, reduction_override='none'))
    ref = _reference(pred, target, None, -1.0, -1.0, 'none', 1.0)
    assert jnp.allclose(out, ref, rtol=1e-5, atol=1e-6)

    # 5) bf16 inputs (halved input DMA; math still f32 inside the kernel)
    out = jax.block_until_ready(
        loss_mod(pred.astype(jnp.bfloat16), target.astype(jnp.bfloat16)))
    ref = _reference(pred.astype(jnp.bfloat16), target.astype(jnp.bfloat16),
                     None, -1.0, -1.0, 'mean', 1.0)
    assert jnp.allclose(out, ref, rtol=1e-5, atol=1e-6), (out, ref)

    print("KERNEL_OK")
</pallas_src>

<mosaic_0001>
module attributes {stable_mosaic.version = 11 : i64} {
  func.func @kernel(%arg0: i32, %arg1: memref<64x128xf32, #tpu.memory_space<vmem>>, %arg2: memref<64x128xf32, #tpu.memory_space<vmem>>, %arg3: memref<1x8x128xf32, #tpu.memory_space<vmem>>) attributes {dimension_semantics = [#tpu.dimension_semantics<parallel>], iteration_bounds = array<i64: 1>, scalar_prefetch = 0 : i64, scratch_operands = 0 : i64, tpu.core_type = #tpu.core_type<tc>, window_params = [{transform_indices = @transform_0, window_bounds = array<i64: 64, 128>}, {transform_indices = @transform_1, window_bounds = array<i64: 64, 128>}, {transform_indices = @transform_2, window_bounds = array<i64: 1, 8, 128>}]} {
    %c0 = arith.constant 0 : index
    %c0_0 = arith.constant 0 : index
    %0 = vector.load %arg1[%c0, %c0_0] : memref<64x128xf32, #tpu.memory_space<vmem>>, vector<64x128xf32>
    %c0_1 = arith.constant 0 : index
    %c0_2 = arith.constant 0 : index
    %1 = vector.load %arg2[%c0_1, %c0_2] : memref<64x128xf32, #tpu.memory_space<vmem>>, vector<64x128xf32>
    %cst = arith.constant 0.000000e+00 : f32
    %cst_3 = arith.constant 1.000000e+00 : f32
    %2 = vector.broadcast %cst : f32 to vector<64x128xf32>
    %3 = arith.maximumf %2, %0 : vector<64x128xf32>
    %4 = vector.broadcast %cst_3 : f32 to vector<64x128xf32>
    %5 = arith.minimumf %4, %3 : vector<64x128xf32>
    %6 = arith.subf %5, %1 : vector<64x128xf32>
    %7 = arith.mulf %6, %6 : vector<64x128xf32>
    %8 = vector.shape_cast %7 : vector<64x128xf32> to vector<8x8x128xf32>
    %cst_4 = arith.constant dense<0.000000e+00> : vector<8x128xf32>
    %9 = vector.multi_reduction <add>, %8, %cst_4 [0] : vector<8x8x128xf32> to vector<8x128xf32>
    %c0_5 = arith.constant 0 : index
    %c0_6 = arith.constant 0 : index
    %c0_7 = arith.constant 0 : index
    %10 = vector.load %arg3[%c0_5, %c0_6, %c0_7] : memref<1x8x128xf32, #tpu.memory_space<vmem>>, vector<1x8x128xf32>
    %11 = vector.shape_cast %10 : vector<1x8x128xf32> to vector<8x128xf32>
    %12 = vector.shape_cast %9 : vector<8x128xf32> to vector<1x8x128xf32>
    tpu.vector_store %arg3[%c0_5, %c0_6, %c0_7], %12 {strides = array<i32>} : memref<1x8x128xf32, #tpu.memory_space<vmem>>, vector<1x8x128xf32>,
    return
  }
  func.func @transform_0(%arg0: i32) -> (i32, i32) {
    %c0_i32 = arith.constant 0 : i32
    %c0_i32_0 = arith.constant 0 : i32
    return %arg0, %c0_i32 : i32, i32
  }
  func.func @transform_1(%arg0: i32) -> (i32, i32) {
    %c0_i32 = arith.constant 0 : i32
    %c0_i32_0 = arith.constant 0 : i32
    return %arg0, %c0_i32 : i32, i32
  }
  func.func @transform_2(%arg0: i32) -> (i32, i32, i32) {
    %c0_i32 = arith.constant 0 : i32
    %c0_i32_0 = arith.constant 0 : i32
    %c0_i32_1 = arith.constant 0 : i32
    return %arg0, %c0_i32, %c0_i32_0 : i32, i32, i32
  }
}

</mosaic_0001>

<bundles_post_ra>
// kernel: _l2_sum_pallas.1
= control target key start
LH: loop header
LB: loop body
LE: loop exit
PB: predicated region body
PF: predicated region fallthrough
CT: control target
= control target key end

     0   :  { %s137_s0 = inlined_call_operand.vmem [shape: f32[64,128], index: 0, kind: input, shape index: {}]   ;;  %s138_s1 = inlined_call_operand.vmem [shape: f32[64,128], index: 1, kind: input, shape index: {}]   ;;  %s139_s2 = inlined_call_operand.vmem [shape: f32[1,8,128], index: 2, kind: output, shape index: {}]  }
   0x1   :  { %v11_v0 = vld [vmem:[%s137_s0] sm:$0xff]  ;;  %v12_v1 = vld [vmem:[%s137_s0 + $0x8] sm:$0xff]  ;;  %v13_v2 = vld [vmem:[%s137_s0 + $0x10] sm:$0xff] }
   0x2   :  { %v14_v3 = vld [vmem:[%s137_s0 + $0x18] sm:$0xff]  ;;  %v15_v4 = vld [vmem:[%s137_s0 + $0x20] sm:$0xff]  ;;  %v16_v5 = vld [vmem:[%s137_s0 + $0x28] sm:$0xff]  ;;  %v27_v6 = vmax.f32 %v11_v0, 0.0  ;;  %v28_v7 = vmax.f32 %v12_v1, 0.0  ;;  %v29_v8 = vmax.f32 %v13_v2, 0.0 }
   0x3   :  { %v17_v9 = vld [vmem:[%s137_s0 + $0x30] sm:$0xff]  ;;  %v18_v10 = vld [vmem:[%s137_s0 + $0x38] sm:$0xff]  ;;  %v19_v11 = vld [vmem:[%s138_s1] sm:$0xff]  ;;  %v30_v12 = vmax.f32 %v14_v3, 0.0  ;;  %v31_v13 = vmax.f32 %v15_v4, 0.0  ;;  %v32_v14 = vmax.f32 %v16_v5, 0.0 }
   0x4   :  { %v20_v15 = vld [vmem:[%s138_s1 + $0x8] sm:$0xff]  ;;  %v21_v16 = vld [vmem:[%s138_s1 + $0x10] sm:$0xff]  ;;  %v22_v17 = vld [vmem:[%s138_s1 + $0x18] sm:$0xff]  ;;  %v33_v18 = vmax.f32 %v17_v9, 0.0  ;;  %v35_v19 = vmin.f32 %v27_v6, 1.0  ;;  %v36_v20 = vmin.f32 %v28_v7, 1.0 }
   0x5   :  { %v37_v21 = vmin.f32 %v29_v8, 1.0  ;;  %v38_v22 = vmin.f32 %v30_v12, 1.0  ;;  %v23_v23 = vld [vmem:[%s138_s1 + $0x20] sm:$0xff]  ;;  %v34_v24 = vmax.f32 %v18_v10, 0.0  ;;  %v39_v25 = vmin.f32 %v31_v13, 1.0  ;;  %v24_v31 = vld [vmem:[%s138_s1 + $0x28] sm:$0xff] }
   0x6   :  { %v40_v26 = vmin.f32 %v32_v14, 1.0  ;;  %v43_v27 = vsub.f32 %v35_v19, %v19_v11  ;;  %v44_v28 = vsub.f32 %v36_v20, %v20_v15  ;;  %v41_v32 = vmin.f32 %v33_v18, 1.0  ;;  %v25_v37 = vld [vmem:[%s138_s1 + $0x30] sm:$0xff]  ;;  %v26_v42 = vld [vmem:[%s138_s1 + $0x38] sm:$0xff] }
   0x7   :  { %v45_v29 = vsub.f32 %v37_v21, %v21_v16  ;;  %v46_v30 = vsub.f32 %v38_v22, %v22_v17  ;;  %v47_v33 = vsub.f32 %v39_v25, %v23_v23  ;;  %v42_v38 = vmin.f32 %v34_v24, 1.0 }
   0x8   :  { %v51_v34 = vmul.f32 %v43_v27, %v43_v27  ;;  %v52_v35 = vmul.f32 %v44_v28, %v44_v28  ;;  %v48_v39 = vsub.f32 %v40_v26, %v24_v31  ;;  %v49_v43 = vsub.f32 %v41_v32, %v25_v37 }
   0x9   :  { %v53_v36 = vmul.f32 %v45_v29, %v45_v29  ;;  %v54_v40 = vmul.f32 %v46_v30, %v46_v30  ;;  %v55_v44 = vmul.f32 %v47_v33, %v47_v33  ;;  %v50_v46 = vsub.f32 %v42_v38, %v26_v42 }
   0xa   :  { %v59_v41 = vadd.f32 %v52_v35, %v51_v34  ;;  %v56_v47 = vmul.f32 %v48_v39, %v48_v39  ;;  %v57_v49 = vmul.f32 %v49_v43, %v49_v43 }
   0xb   :  { %v58_v51 = vmul.f32 %v50_v46, %v50_v46 }
   0xc   :  { %v60_v45 = vadd.f32 %v59_v41, %v53_v36 }
   0xe   :  { %v61_v48 = vadd.f32 %v60_v45, %v54_v40 }
  0x10   :  { %v62_v50 = vadd.f32 %v61_v48, %v55_v44 }
  0x12   :  { %v63_v52 = vadd.f32 %v62_v50, %v56_v47 }
  0x14   :  { %v64_v53 = vadd.f32 %v63_v52, %v57_v49 }
  0x16   :  { %v65_v54 = vadd.f32 %v64_v53, %v58_v51 }
  0x18   :  { %66 = vst [vmem:[%s139_s2] sm:$0xff] %v65_v54 }

</bundles_post_ra>
